<compile_context>
chip_gen: v7x
topology: tpu7x:2x2x1
jax: 0.10.0
libtpu: 0.0.40
codegen_flags: <defaults>
</compile_context>

<pallas_src>
import functools

import jax
import jax.numpy as jnp
from jax.experimental import pallas as pl
from jax.experimental.pallas import tpu as pltpu


def _vmem_capacity_bytes():
    """Physical VMEM per TensorCore; conservative fallback if the query fails."""
    try:
        return int(pltpu.get_tpu_info().vmem_capacity_bytes)
    except Exception:
        return 64 << 20  # conservative (v7x-sized) fallback


def _attn_kernel(x_ref, w1_ref, b1_ref, v_ref, bv_ref, ctx_ref, *,
                 compute_dtype, approx_recip):
    bb, S, D = x_ref.shape
    H = w1_ref.shape[1]

    x3 = x_ref[...]                               # (bb, S, D) in input dtype
    xf = x3.astype(jnp.float32)                   # f32 for the weighted sum

    # Hidden projection on the MXU (compute_dtype inputs, f32 accumulate).
    # NOTE: rank-3 x rank-2 dot_general is not lowerable inside a TPU kernel,
    # so the 2-D form is used.  The (bb,S,D)<->(bb*S,*) reshapes are free when
    # S is a multiple of the sublane tile (8 for f32, 16 for bf16); otherwise
    # Mosaic inserts a relayout pass — keep production S sublane-aligned.
    x2 = x3.reshape(bb * S, D).astype(compute_dtype)
    acc = jnp.dot(x2, w1_ref[...].astype(compute_dtype),
                  preferred_element_type=jnp.float32) + b1_ref[...]
    # tanh in compute_dtype (bf16 on v6e/v7x -> ~2x EUP throughput, half the
    # VMEM for h).  Pass compute_dtype=float32 for the exact path / v5e.
    h2 = jnp.tanh(acc.astype(compute_dtype))      # (bb*S, H)
    h3 = h2.reshape(bb, S, H)

    # Score: VPU multiply + XLU lane reduce (avoids an N=1 MXU matmul);
    # v is f32 so the product/reduce accumulates in f32.  bv is an SMEM scalar.
    logits = jnp.sum(h3 * v_ref[...], axis=-1, keepdims=True) + bv_ref[0]
    s = jax.nn.sigmoid(logits.astype(jnp.float32))            # (bb, S, 1)

    # Normalize over the sequence axis per batch row, then weighted sum (f32).
    denom = jnp.sum(s, axis=1, keepdims=True)                  # (bb, 1, 1)
    w = s * pl.reciprocal(denom, approx=approx_recip)          # (bb, S, 1)
    # TODO(synk): for small production D (<128) a lane-dense (bb*D/128, 128)
    # out_spec avoids masked vst.msk stores; skipped here for portability.
    ctx_ref[...] = jnp.sum(w * xf, axis=1).astype(ctx_ref.dtype)   # (bb, D)


def self_attention(x, w1, b1, v, bv, *,
                   compute_dtype=jnp.bfloat16, approx_recip=True):
    """x: (B, S, D); w1: (D, H); b1: (H,); v: (H, 1); bv: (1,). Returns (B, D)."""
    B, S, D = x.shape
    H = w1.shape[1]
    x_item = jnp.dtype(x.dtype).itemsize
    c_item = jnp.dtype(compute_dtype).itemsize

    # Generation-aware VMEM budget: ~75% of physical per-core VMEM, capped at
    # 96 MiB (=> 96 MiB on v5e/v6e's 128 MiB, 48 MiB on v7x's 64 MiB).
    vmem_cap = _vmem_capacity_bytes()
    vmem_budget = min((vmem_cap * 3) // 4, 96 << 20)

    # In-flight bytes per batch row for one grid step (deliberately generous):
    per_row = (
        2 * S * D * x_item                                   # x block, double-buffered
        + S * D * x_item                                     # loaded x temp
        + (0 if x.dtype == jnp.float32 else S * D * 4)       # f32 copy of x (bf16 inputs)
        + S * D * c_item                                     # compute-dtype copy for MXU
        + S * H * 4                                          # matmul accumulate (f32)
        + S * H * c_item                                     # tanh output
        + S * H * 4                                          # h*v product temp (f32)
        + S * D * 4                                          # w*x product temp (f32)
        + 8 * S * 4                                          # logits/sigmoid/weights columns
        + 2 * D * 4                                          # output row, double-buffered
    )

    # Largest batch block that fits the budget, multiple of 8 (sublane-dense
    # output blocks); a block equal to the full batch extent is always legal.
    bb_cap = max(8, ((vmem_budget // per_row) // 8) * 8)
    bb = B if B <= bb_cap else bb_cap

    # v7x-like parts (<=64 MiB VMEM, 2 TensorCores): keep >=2 grid steps on the
    # parallel axis while each block stays >= ~2 MiB.  v5e/v6e: one big block.
    if vmem_cap <= (64 << 20) and bb >= B and B >= 16:
        half = ((pl.cdiv(B, 2) + 7) // 8) * 8
        if half < bb and half * S * D * x_item >= (2 << 20):
            bb = half

    # Ragged last block is handled by Pallas (masked writeback); no host pad.
    grid = pl.cdiv(B, bb)

    vmem_limit = int(min(vmem_cap - (4 << 20), vmem_budget + (16 << 20)))

    kernel = functools.partial(_attn_kernel,
                               compute_dtype=compute_dtype,
                               approx_recip=approx_recip)

    out = pl.pallas_call(
        kernel,
        out_shape=jax.ShapeDtypeStruct((B, D), x.dtype),
        grid_spec=pltpu.PrefetchScalarGridSpec(
            num_scalar_prefetch=0,
            grid=(grid,),
            in_specs=[
                # If xprof ever shows exposed input DMA on v7x, add
                # pipeline_mode=pl.Buffered(3) to this spec.
                pl.BlockSpec((bb, S, D), lambda b: (b, 0, 0)),      # x
                pl.BlockSpec((D, H), lambda b: (0, 0)),             # W1 (transposed)
                pl.BlockSpec((1, H), lambda b: (0, 0)),             # b1
                pl.BlockSpec((1, H), lambda b: (0, 0)),             # V as a row
                pl.BlockSpec(memory_space=pltpu.MemorySpace.SMEM),  # bv scalar
            ],
            out_specs=pl.BlockSpec((bb, D), lambda b: (b, 0)),
        ),
        compiler_params=pltpu.CompilerParams(
            dimension_semantics=("parallel",),
            vmem_limit_bytes=vmem_limit,
        ),
    )(x, w1, b1.reshape(1, H), v.reshape(1, H), bv.reshape(1))
    return out                                                       # (B, D)


def _reference(x, w1, b1, v, bv):
    h = jnp.tanh(jnp.einsum("bsd,dh->bsh", x, w1) + b1)
    s = jax.nn.sigmoid(jnp.einsum("bsh,ho->bso", h, v) + bv)         # (B, S, 1)
    w = s / jnp.sum(s, axis=1, keepdims=True)
    return jnp.sum(w * x, axis=1)                                    # (B, D)


if __name__ == "__main__":
    B, S, D, H = 2, 8, 32, 64

    key = jax.random.PRNGKey(0)
    kx, kw1, kb1, kv, kbv = jax.random.split(key, 5)

    x = jax.random.normal(kx, (B, S, D), dtype=jnp.float32)

    # Deterministic parameter init (PyTorch nn.Linear-style uniform bounds).
    lim1 = 1.0 / jnp.sqrt(D)
    limv = 1.0 / jnp.sqrt(H)
    w1 = jax.random.uniform(kw1, (D, H), minval=-lim1, maxval=lim1,
                            dtype=jnp.float32)      # W1.weight.T
    b1 = jax.random.uniform(kb1, (H,), minval=-lim1, maxval=lim1,
                            dtype=jnp.float32)      # W1.bias
    v = jax.random.uniform(kv, (H, 1), minval=-limv, maxval=limv,
                           dtype=jnp.float32)       # V.weight.T
    bv = jax.random.uniform(kbv, (1,), minval=-limv, maxval=limv,
                            dtype=jnp.float32)      # V.bias

    ref = _reference(x, w1, b1, v, bv)

    # Exact-math path: f32 MXU/tanh + exact reciprocal -> tight tolerance.
    out_exact = jax.block_until_ready(
        self_attention(x, w1, b1, v, bv,
                       compute_dtype=jnp.float32, approx_recip=False))
    assert out_exact.shape == (B, D)
    assert jnp.allclose(out_exact, ref, atol=1e-5, rtol=1e-5), \
        "exact-path mismatch vs reference"

    # Fast path (default): bf16 MXU/tanh + approx reciprocal -> loose tolerance.
    # (Re-validate tolerance at production D/H before keeping bf16 by default.)
    out_fast = jax.block_until_ready(self_attention(x, w1, b1, v, bv))
    assert out_fast.shape == (B, D)
    assert jnp.allclose(out_fast, ref, atol=3e-2, rtol=3e-2), \
        "fast-path mismatch vs reference"

    print("KERNEL_OK")
</pallas_src>

<mosaic_0001>
module attributes {stable_mosaic.version = 11 : i64} {
  func.func @_attn_kernel(%arg0: i32, %arg1: memref<2x8x32xf32, #tpu.memory_space<vmem>>, %arg2: memref<32x64xf32, #tpu.memory_space<vmem>>, %arg3: memref<1x64xf32, #tpu.memory_space<vmem>>, %arg4: memref<1x64xf32, #tpu.memory_space<vmem>>, %arg5: memref<1xf32, #tpu.memory_space<smem>>, %arg6: memref<2x32xf32, #tpu.memory_space<vmem>>) attributes {dimension_semantics = [#tpu.dimension_semantics<parallel>], iteration_bounds = array<i64: 1>, scalar_prefetch = 0 : i64, scratch_operands = 0 : i64, tpu.core_type = #tpu.core_type<tc>, window_params = [{transform_indices = @transform_0, window_bounds = array<i64: 2, 8, 32>}, {pipeline_mode = #tpu.pipeline_mode<synchronous>, transform_indices = @transform_1, window_bounds = array<i64: 32, 64>}, {pipeline_mode = #tpu.pipeline_mode<synchronous>, transform_indices = @transform_2, window_bounds = array<i64: 1, 64>}, {pipeline_mode = #tpu.pipeline_mode<synchronous>, transform_indices = @transform_3, window_bounds = array<i64: 1, 64>}, {transform_indices = @transform_4, window_bounds = array<i64: 1>}, {transform_indices = @transform_5, window_bounds = array<i64: 2, 32>}]} {
    %c0 = arith.constant 0 : index
    %c0_0 = arith.constant 0 : index
    %c0_1 = arith.constant 0 : index
    %0 = vector.load %arg1[%c0, %c0_0, %c0_1] : memref<2x8x32xf32, #tpu.memory_space<vmem>>, vector<2x8x32xf32>
    %1 = vector.shape_cast %0 : vector<2x8x32xf32> to vector<16x32xf32>
    %c0_2 = arith.constant 0 : index
    %c0_3 = arith.constant 0 : index
    %2 = vector.load %arg2[%c0_2, %c0_3] : memref<32x64xf32, #tpu.memory_space<vmem>>, vector<32x64xf32>
    %cst = arith.constant dense<0.000000e+00> : vector<16x64xf32>
    %3 = tpu.matmul %1, %2, %cst {dimension_numbers = #tpu.dot_dimension_numbers<[1], [0], [0], [1], [0, 0, 1, 1], [], []>} : vector<16x32xf32>, vector<32x64xf32>, vector<16x64xf32> -> vector<16x64xf32>
    %c0_4 = arith.constant 0 : index
    %c0_5 = arith.constant 0 : index
    %4 = vector.load %arg3[%c0_4, %c0_5] : memref<1x64xf32, #tpu.memory_space<vmem>>, vector<1x64xf32>
    %5 = vector.broadcast %4 : vector<1x64xf32> to vector<16x64xf32>
    %6 = arith.addf %3, %5 : vector<16x64xf32>
    %7 = math.tanh %6 : vector<16x64xf32>
    %8 = vector.shape_cast %7 : vector<16x64xf32> to vector<2x8x64xf32>
    %c0_6 = arith.constant 0 : index
    %c0_7 = arith.constant 0 : index
    %9 = vector.load %arg4[%c0_6, %c0_7] : memref<1x64xf32, #tpu.memory_space<vmem>>, vector<1x64xf32>
    %10 = vector.shape_cast %9 : vector<1x64xf32> to vector<1x1x64xf32>
    %11 = vector.broadcast %10 : vector<1x1x64xf32> to vector<2x8x64xf32>
    %12 = arith.mulf %8, %11 : vector<2x8x64xf32>
    %cst_8 = arith.constant dense<0.000000e+00> : vector<2x8xf32>
    %13 = vector.multi_reduction <add>, %12, %cst_8 [2] : vector<2x8x64xf32> to vector<2x8xf32>
    %14 = vector.shape_cast %13 : vector<2x8xf32> to vector<2x8x1xf32>
    %c0_9 = arith.constant 0 : index
    %15 = memref.load %arg5[%c0_9] : memref<1xf32, #tpu.memory_space<smem>>
    %16 = vector.broadcast %15 : f32 to vector<2x8x1xf32>
    %17 = arith.addf %14, %16 : vector<2x8x1xf32>
    %18 = arith.negf %17 : vector<2x8x1xf32>
    %19 = math.exp %18 : vector<2x8x1xf32>
    %cst_10 = arith.constant 1.000000e+00 : f32
    %20 = vector.broadcast %cst_10 : f32 to vector<2x8x1xf32>
    %21 = arith.addf %20, %19 : vector<2x8x1xf32>
    %22 = arith.divf %20, %21 : vector<2x8x1xf32>
    %cst_11 = arith.constant dense<0.000000e+00> : vector<2x1xf32>
    %23 = vector.multi_reduction <add>, %22, %cst_11 [1] : vector<2x8x1xf32> to vector<2x1xf32>
    %24 = vector.shape_cast %23 : vector<2x1xf32> to vector<2x1x1xf32>
    %25 = tpu.reciprocal %24 : vector<2x1x1xf32> -> vector<2x1x1xf32>
    %26 = vector.broadcast %25 : vector<2x1x1xf32> to vector<2x8x1xf32>
    %27 = arith.mulf %22, %26 : vector<2x8x1xf32>
    %28 = vector.broadcast %27 : vector<2x8x1xf32> to vector<2x8x32xf32>
    %29 = arith.mulf %28, %0 : vector<2x8x32xf32>
    %cst_12 = arith.constant dense<0.000000e+00> : vector<2x32xf32>
    %30 = vector.multi_reduction <add>, %29, %cst_12 [1] : vector<2x8x32xf32> to vector<2x32xf32>
    %c0_13 = arith.constant 0 : index
    %c0_14 = arith.constant 0 : index
    %31 = vector.load %arg6[%c0_13, %c0_14] : memref<2x32xf32, #tpu.memory_space<vmem>>, vector<2x32xf32>
    tpu.vector_store %arg6[%c0_13, %c0_14], %30 {strides = array<i32>} : memref<2x32xf32, #tpu.memory_space<vmem>>, vector<2x32xf32>,
    return
  }
  func.func @transform_0(%arg0: i32) -> (i32, i32, i32) {
    %c0_i32 = arith.constant 0 : i32
    %c0_i32_0 = arith.constant 0 : i32
    %c0_i32_1 = arith.constant 0 : i32
    return %arg0, %c0_i32, %c0_i32_0 : i32, i32, i32
  }
  func.func @transform_1(%arg0: i32) -> (i32, i32) {
    %c0_i32 = arith.constant 0 : i32
    %c0_i32_0 = arith.constant 0 : i32
    %c0_i32_1 = arith.constant 0 : i32
    return %c0_i32, %c0_i32_0 : i32, i32
  }
  func.func @transform_2(%arg0: i32) -> (i32, i32) {
    %c0_i32 = arith.constant 0 : i32
    %c0_i32_0 = arith.constant 0 : i32
    %c0_i32_1 = arith.constant 0 : i32
    return %c0_i32, %c0_i32_0 : i32, i32
  }
  func.func @transform_3(%arg0: i32) -> (i32, i32) {
    %c0_i32 = arith.constant 0 : i32
    %c0_i32_0 = arith.constant 0 : i32
    %c0_i32_1 = arith.constant 0 : i32
    return %c0_i32, %c0_i32_0 : i32, i32
  }
  func.func @transform_4(%arg0: i32) -> i32 {
    %c0_i32 = arith.constant 0 : i32
    %c0_i32_0 = arith.constant 0 : i32
    return %c0_i32 : i32
  }
  func.func @transform_5(%arg0: i32) -> (i32, i32) {
    %c0_i32 = arith.constant 0 : i32
    %c0_i32_0 = arith.constant 0 : i32
    return %arg0, %c0_i32 : i32, i32
  }
}

</mosaic_0001>

<bundles_post_ra>
// kernel: tpu_custom_call.1
= control target key start
LH: loop header
LB: loop body
LE: loop exit
PB: predicated region body
PF: predicated region fallthrough
CT: control target
= control target key end

     0   :  { %11 = vsyncpa [#allocation4], 0  ;;  %s442_s0 = inlined_call_operand.hbm [shape: f32[2,8,32], index: 0, kind: input, shape index: {}]   ;;  %s443_s1 = inlined_call_operand.hbm [shape: f32[32,64], index: 1, kind: input, shape index: {}]   ;;  %s444_s2 = inlined_call_operand.vmem [shape: f32[1,64], index: 2, kind: input, shape index: {}]   ;;  %s445_s3 = inlined_call_operand.vmem [shape: f32[1,64], index: 3, kind: input, shape index: {}]   ;;  %s446_s4 = inlined_call_operand.<no memory space> [shape: f32[1], index: 4, kind: input, shape index: {}]   ;;  %s447_s5 = inlined_call_operand.hbm [shape: f32[2,32], index: 5, kind: output, shape index: {}]  }
   0x1   :  { %12 = vsyncpa [#allocation7], 0 }
   0x2   :  { %13 = vsyncpa [#allocation5], 0  ;;  %s358_s18 = smov [#allocation3]   ;;  %s286_s22 = scalar_lea.hbm %s442_s0, 256 }
   0x3   :  { %s19_s19 = sshll.u32 %s358_s18, 4  ;;  %p287_p0 = scmp.ne.s32.totalorder %s442_s0, %s286_s22  ;;  %s20_s19 = int_to_ptr.vmem [resolvable:$true] %s19_s19 }
   0x4   :  { %p290_p1 = scmp.lt.u32.totalorder %s286_s22, %s442_s0 }
   0x6   :  { %p292_p2 = pnand %p290_p1, %p287_p0 }
   0x8   :  { %295 = shalt.err (!%p292_p2)
}
   0x9   :  { %s296_s27 = scalar_lea.vmem %s20_s19, 256  ;;  %p301_p4 = scmp.lt.s32.totalorder %s20_s19, %s20_s19 }
   0xa   :  { %p297_p3 = scmp.ne.s32.totalorder %s20_s19, %s296_s27  ;;  %p302_p5 = scmp.lt.s32.totalorder %s296_s27, %s296_s27 }
   0xc   :  { %p303_p6 = por %p302_p5, %p301_p4 }
   0xe   :  { %p304_p7 = pnand %p303_p6, %p297_p3 }
  0x10   :  { %307 = shalt.err (!%p304_p7)
}
  0x11   :  { %s359_s28 = smov 128   ;;  %s360_s29 = smov 8  }
  0x12   :  { %25 = dma.hbm_to_vmem [thread:$0]  %s442_s0, 256, %s20_s19, [#allocation4], %s359_s28, %s359_s28, %s360_s29  }
  0x13   :  { %s361_s7 = smov [#allocation6]   ;;  %s308_s11 = scalar_lea.hbm %s443_s1, 512 }
  0x14   :  { %s31_s8 = sshll.u32 %s361_s7, 4  ;;  %p309_p8 = scmp.ne.s32.totalorder %s443_s1, %s308_s11  ;;  %s32_s8 = int_to_ptr.vmem [resolvable:$true] %s31_s8 }
  0x15   :  { %p312_p9 = scmp.lt.u32.totalorder %s308_s11, %s443_s1 }
  0x17   :  { %p314_p10 = pnand %p312_p9, %p309_p8 }
  0x19   :  { %317 = shalt.err (!%p314_p10)
}
  0x1a   :  { %s318_s16 = scalar_lea.vmem %s32_s8, 512  ;;  %p323_p12 = scmp.lt.s32.totalorder %s32_s8, %s32_s8 }
  0x1b   :  { %p319_p11 = scmp.ne.s32.totalorder %s32_s8, %s318_s16  ;;  %p324_p13 = scmp.lt.s32.totalorder %s318_s16, %s318_s16 }
  0x1d   :  { %p325_p0 = por %p324_p13, %p323_p12 }
  0x1f   :  { %p326_p1 = pnand %p325_p0, %p319_p11 }
  0x21   :  { %329 = shalt.err (!%p326_p1)
}
  0x22   :  { %37 = dma.hbm_to_vmem [thread:$0]  %s443_s1, 512, %s32_s8, [#allocation7], %s359_s28, %s359_s28, %s360_s29  }
  0x23   :  { %352 = dma.done.wait [#allocation4], 256  }
  0x24   :  { %353 = vsyncadd [#allocation4], 4294967040 }
  0x25   :  { %354 = dma.done.wait [#allocation7], 512  }
  0x26   :  { %355 = vsyncadd [#allocation7], 4294966784  ;;  %vm63_vm0 = vcmask 261120   ;;  %v52_v0 = vld [vmem:[#allocation6] sm:$0xff]  ;;  %v53_v1 = vld [vmem:[#allocation6 + $0x8] sm:$0xff]  ;;  %vm156_vm1 = vcmask 523264   ;;  %v164_v20 = vstv %s446_s4 }
  0x27   :  { %v54_v2 = vld [vmem:[#allocation6 + $0x10] sm:$0xff]  ;;  %v257_v3 = vpack.c.bf16 %v53_v1, %v52_v0  ;;  %v55_v4 = vld [vmem:[#allocation6 + $0x18] sm:$0xff]  ;;  %vm213_vm2 = vcmask 1041409   ;;  %vm216_vm3 = vcmask 254976  }
  0x28   :  { %v50_v5 = vld [vmem:[#allocation3] sm:$0xff]  ;;  %v261_v6 = vpack.c.bf16 %v55_v4, %v54_v2  ;;  %v51_v7 = vld [vmem:[#allocation3 + $0x8] sm:$0xff] }
  0x29   :  { %254 = vmatprep.mubr.msk.f32.mxu0 %vm63_vm0, %v50_v5  ;;  %258 = vmatprep.subr.bf16.mxu0 %v257_v3  ;;  %v234_v8 = vld [vmem:[%s444_s2] ss:$0 sm:$0xff] }
  0x2a   :  { %260 = vmatpush3.bf16.msra.mxu0 %v257_v3  ;;  %v237_v13 = vld [vmem:[%s445_s3] ss:$0 sm:$0xff]  ;;  %s362_s3 = smov [#allocation8]  }
  0x2b   :  { %262 = vmatprep.subr.bf16.mxu0 %v261_v6  ;;  %s224_s4 = sshll.u32 %s362_s3, 4  ;;  %s225_s4 = int_to_ptr.vmem [resolvable:$true] %s224_s4 }
  0x2c   :  { %s330_s22 = scalar_lea.vmem %s225_s4, 32  ;;  %p335_p3 = scmp.lt.s32.totalorder %s225_s4, %s225_s4 }
  0x2d   :  { %p331_p2 = scmp.ne.s32.totalorder %s225_s4, %s330_s22  ;;  %p336_p4 = scmp.lt.s32.totalorder %s330_s22, %s330_s22 }
  0x2e   :  { %264 = vmatpush3.bf16.msra.mxu0 %v261_v6 }
  0x2f   :  { %p337_p5 = por %p336_p4, %p335_p3 }
  0x31   :  { %255 = vmatmul.mubr.msk.f32.vlgmr.msra.gmra.mrb[0].mxu0 %vm63_vm0, %v51_v7  ;;  %p338_p6 = pnand %p337_p5, %p331_p2 }
 0x104   :  { %v256_v9 = vpop.f32.mrb[0].mxu0 }
 0x105   :  { %v142_v10 = vadd.f32 %v256_v9, %v234_v8  ;;  %v136_v11 = vpop.f32.mrb[1].mxu0 }
 0x106   :  { %v137_v12 = vadd.f32 %v234_v8, %v136_v11 }
 0x107   :  { %270 = vtanh.f32 %v142_v10 }
 0x108   :  { %272 = vtanh.f32 %v137_v12 }
 0x111   :  { %v271_v14 = vpop.eup %270 }
 0x112   :  { %v273_v15 = vpop.eup %272  ;;  %v155_v18 = vmul.f32 %v271_v14, %v237_v13 }
 0x113   :  { %v154_v16 = vmul.f32 %v273_v15, %v237_v13 }
 0x114   :  { %v160_v19 = vsel %vm156_vm1, %v155_v18, 0.0 }
 0x115   :  { %v157_v17 = vsel %vm156_vm1, %v154_v16, 0.0 }
 0x116   :  { %158 = vadd.xlane.f32.xlu0 %v157_v17 }
 0x11a   :  { %161 = vadd.xlane.f32.xlu0 %v160_v19 }
 0x1a3   :  { %v159_v21 = vpop.xlane.xlu0 %158 }
 0x1a4   :  { %v165_v22 = vadd.f32 %v164_v20, %v159_v21 }
 0x1a6   :  { %v238_v23 = vmul.f32 -1.442695, %v165_v22 }
 0x1a7   :  { %v162_v24 = vpop.xlane.xlu0 %161 }
 0x1a8   :  { %274 = vpow2.f32 %v238_v23  ;;  %v166_v25 = vadd.f32 %v164_v20, %v162_v24 }
 0x1aa   :  { %v239_v26 = vmul.f32 -1.442695, %v166_v25 }
 0x1ac   :  { %276 = vpow2.f32 %v239_v26 }
 0x1b2   :  { %v275_v27 = vpop.eup %274 }
 0x1b3   :  { %v173_v28 = vadd.f32 1.0, %v275_v27 }
 0x1b5   :  { %278 = vrcp.f32 %v173_v28 }
 0x1b6   :  { %v277_v29 = vpop.eup %276 }
 0x1b7   :  { %v174_v30 = vadd.f32 1.0, %v277_v29 }
 0x1b9   :  { %280 = vrcp.f32 %v174_v30 }
 0x1bf   :  { %v279_v31 = vpop.eup %278 }
 0x1c0   :  { %v179_v32 = vrot.slane %v279_v31, 4 }
 0x1c2   :  { %v180_v33 = vadd.f32 %v279_v31, %v179_v32 }
 0x1c3   :  { %v281_v34 = vpop.eup %280 }
 0x1c4   :  { %v181_v35 = vrot.slane %v180_v33, 2  ;;  %v185_v36 = vrot.slane %v281_v34, 4 }
 0x1c6   :  { %v186_v37 = vadd.f32 %v281_v34, %v185_v36  ;;  %v182_v38 = vadd.f32 %v181_v35, %v180_v33 }
 0x1c8   :  { %v187_v39 = vrot.slane %v186_v37, 2  ;;  %v183_v40 = vrot.slane %v182_v38, 1 }
 0x1ca   :  { %v184_v41 = vadd.f32 %v183_v40, %v182_v38  ;;  %v188_v42 = vadd.f32 %v187_v39, %v186_v37 }
 0x1cc   :  { %v189_v43 = vrot.slane %v188_v42, 1  ;;  %282 = vrcp.f32 %v184_v41 }
 0x1ce   :  { %v190_v44 = vadd.f32 %v189_v43, %v188_v42 }
 0x1d0   :  { %284 = vrcp.f32 %v190_v44 }
 0x1d6   :  { %v283_v45 = vpop.eup %282 }
 0x1d7   :  { %v193_v46 = vmul.f32 %v283_v45, %v279_v31 }
 0x1d9   :  { %v195_v47 = vmul.f32 %v193_v46, %v50_v5 }
 0x1da   :  { %v285_v48 = vpop.eup %284 }
 0x1db   :  { %v194_v49 = vmul.f32 %v285_v48, %v281_v34  ;;  %v197_v50 = vsel %vm63_vm0, %v195_v47, 0.0 }
 0x1dc   :  { %v198_v51 = vrot.slane %v197_v50, 4 }
 0x1dd   :  { %v196_v52 = vmul.f32 %v194_v49, %v51_v7 }
 0x1de   :  { %v199_v53 = vadd.f32 %v198_v51, %v197_v50 }
 0x1df   :  { %v204_v54 = vsel %vm63_vm0, %v196_v52, 0.0 }
 0x1e0   :  { %v200_v55 = vrot.slane %v199_v53, 2  ;;  %v205_v56 = vrot.slane %v204_v54, 4 }
 0x1e2   :  { %v201_v57 = vadd.f32 %v200_v55, %v199_v53  ;;  %v206_v58 = vadd.f32 %v205_v56, %v204_v54 }
 0x1e4   :  { %v207_v59 = vrot.slane %v206_v58, 2  ;;  %v202_v60 = vrot.slane %v201_v57, 1 }
 0x1e6   :  { %v208_v61 = vadd.f32 %v207_v59, %v206_v58  ;;  %v203_v63 = vadd.f32 %v202_v60, %v201_v57 }
 0x1e8   :  { %v209_v62 = vrot.slane %v208_v61, 1 }
 0x1ea   :  { %v210_v0 = vadd.f32 %v209_v62, %v208_v61 }
 0x1ec   :  { %v214_v1 = vsel %vm213_vm2, %v210_v0, %v203_v63 }
 0x1ed   :  { %217 = vst.msk [vmem:[#allocation8] sm:$0x3] %vm216_vm3, %v214_v1 }
 0x1ee   :  { %341 = shalt.err (!%p338_p6)
}
 0x1ef   :  { %s342_s25 = scalar_lea.hbm %s447_s5, 32 }
 0x1f0   :  { %p343_p7 = scmp.ne.s32.totalorder %s447_s5, %s342_s25  ;;  %p346_p8 = scmp.lt.u32.totalorder %s342_s25, %s447_s5 }
 0x1f2   :  { %p348_p9 = pnand %p346_p8, %p343_p7 }
 0x1f4   :  { %351 = shalt.err (!%p348_p9)
}
 0x1f5   :  { %227 = dma.vmem_to_hbm [thread:$0]  %s225_s4, 32, %s447_s5, [#allocation5]  }
 0x1f6   :  { %356 = dma.done.wait [#allocation5], 32  }
 0x1f7   :  { %357 = vsyncadd [#allocation5], 4294967264 }
 0x1f8   :  { %231 = vsyncpa [#allocation4], 1 }
 0x1f9   :  { %232 = vsyncpa [#allocation7], 1 }
 0x1fa   :  { %233 = vsyncpa [#allocation5], 1 }

</bundles_post_ra>
